<compile_context>
chip_gen: v7x
topology: tpu7x:2x2x1
jax: 0.10.0
libtpu: 0.0.40
codegen_flags: <defaults>
</compile_context>

<pallas_src>
import jax
import jax.numpy as jnp
from jax.experimental import pallas as pl
from jax.experimental.pallas import tpu as pltpu

_LANES = 128                      # vreg lane width (fast axis)
_SUBLANES = 8                     # vreg sublane count (slow axis)
_ALIGN = _LANES * _SUBLANES       # 1024 elements = one (8, 128) f32 tile
_MIN_TILE_ROWS = 512              # floor: 512*128*4B = 256 KiB blocks
_DEFAULT_TILE_ROWS = 4096         # 4096*128*4B = 2 MiB blocks
_MIN_PALLAS_ELEMENTS = 64 * 1024  # below this, fused XLA x*w+b wins


def _linreg_kernel(params_ref, x_ref, o_ref):
    # params_ref: (2,) f32 in SMEM -> [w, b]; x_ref / o_ref: (tm, 128) f32 VMEM tiles.
    w = params_ref[0]
    b = params_ref[1]
    o_ref[...] = x_ref[...] * w + b


def _round_up(v, mult):
    return -(-v // mult) * mult


def _linreg_pallas_2d(x2d, params, tile_rows):
    """Run the kernel over a lane-dense (m, 128) f32 slab."""
    m = x2d.shape[0]

    # Clamp requested tile_rows to a sane floor, keep multiple of 8 sublanes.
    tile_rows = max(int(tile_rows), _MIN_TILE_ROWS)
    tile_rows = (tile_rows // _SUBLANES) * _SUBLANES
    # Cap so the 'parallel' grid axis has >= 2 steps when possible (v7x: 2 TCs/chip).
    half = max(_SUBLANES, _round_up(-(-m // 2), _SUBLANES))
    tm = max(_SUBLANES, min(tile_rows, m, half))
    grid = (pl.cdiv(m, tm),)

    elems = m * _LANES
    cost = pl.CostEstimate(
        flops=2 * elems, transcendentals=0, bytes_accessed=2 * elems * 4
    )
    # input + output, double-buffered, plus 2 MiB headroom; at least 16 MiB.
    vmem_bytes = max(4 * tm * _LANES * 4 + (2 << 20), 16 << 20)

    return pl.pallas_call(
        _linreg_kernel,
        out_shape=jax.ShapeDtypeStruct((m, _LANES), jnp.float32),
        grid=grid,
        in_specs=[
            pl.BlockSpec(memory_space=pltpu.SMEM),               # [w, b] scalars
            pl.BlockSpec((tm, _LANES), lambda i: (i, 0)),        # x tile
        ],
        out_specs=pl.BlockSpec((tm, _LANES), lambda i: (i, 0)),  # out tile
        compiler_params=pltpu.CompilerParams(
            dimension_semantics=("parallel",),
            vmem_limit_bytes=vmem_bytes,
        ),
        cost_estimate=cost,
    )(params, x2d)


def linear_regression_forward(
    x,
    weight,
    bias,
    *,
    tile_rows=_DEFAULT_TILE_ROWS,
    min_pallas_elements=_MIN_PALLAS_ELEMENTS,
):
    """x: (N, 1) f32, weight: (1, 1) f32, bias: (1,) f32 -> (N, 1) f32."""
    n = x.shape[0]
    w = weight.reshape(()).astype(jnp.float32)
    b = bias.reshape(()).astype(jnp.float32)

    if n == 0:
        return jnp.zeros((0, 1), jnp.float32)

    x_flat = x.reshape(-1).astype(jnp.float32)

    if n < min_pallas_elements:
        # pallas_call fixed overhead + layout plumbing dominates tiny batches;
        # a single fused XLA multiply-add is strictly faster here.
        return (x_flat * w + b).reshape(n, 1)

    params = jnp.stack([w, b])

    if n % _ALIGN == 0:
        # Fast path: reshapes are free, no pad / slice HBM copies at all.
        out2d = _linreg_pallas_2d(
            x_flat.reshape(n // _LANES, _LANES), params, tile_rows
        )
        return out2d.reshape(n, 1)

    n_main = (n // _ALIGN) * _ALIGN
    if n_main == 0:
        # Tiny ragged input forced onto the kernel path: pad to one aligned tile.
        x_pad = jnp.pad(x_flat, (0, _ALIGN - n))
        out2d = _linreg_pallas_2d(
            x_pad.reshape(_SUBLANES, _LANES), params, tile_rows
        )
        return out2d.reshape(-1)[:n].reshape(n, 1)

    # Ragged: kernel on the 1024-aligned prefix, fused jnp epilogue on the short tail.
    out_main = _linreg_pallas_2d(
        x_flat[:n_main].reshape(n_main // _LANES, _LANES), params, tile_rows
    ).reshape(n_main)
    out_tail = x_flat[n_main:] * w + b
    return jnp.concatenate([out_main, out_tail]).reshape(n, 1)


if __name__ == "__main__":
    key = jax.random.PRNGKey(0)
    kx, kw, kb, kx2, kx3 = jax.random.split(key, 5)

    # Deterministic parameter init (mimicking nn.Linear's uniform init range).
    weight = jax.random.uniform(kw, (1, 1), dtype=jnp.float32, minval=-1.0, maxval=1.0)
    bias = jax.random.uniform(kb, (1,), dtype=jnp.float32, minval=-1.0, maxval=1.0)

    # 1) Tiny batch matching the original usage (N, 1): takes the fused-jnp fallback.
    N = 8
    x = jax.random.normal(kx, (N, 1), dtype=jnp.float32)
    out = jax.block_until_ready(linear_regression_forward(x, weight, bias))
    ref = x @ weight.T + bias
    assert out.shape == (N, 1)
    assert jnp.allclose(out, ref, atol=1e-6), "mismatch vs reference (small N fallback)"

    # 2) Aligned batch forced onto the Pallas path: no pad/slice copies, >=2 grid steps.
    N2 = 4096
    x2 = jax.random.normal(kx2, (N2, 1), dtype=jnp.float32)
    out2 = jax.block_until_ready(
        linear_regression_forward(x2, weight, bias, min_pallas_elements=0)
    )
    ref2 = x2 @ weight.T + bias
    assert out2.shape == (N2, 1)
    assert jnp.allclose(out2, ref2, atol=1e-6), "mismatch vs reference (aligned N)"

    # 3) Ragged batch forced onto the Pallas path: kernel prefix + jnp tail epilogue.
    N3 = 2500
    x3 = jax.random.normal(kx3, (N3, 1), dtype=jnp.float32)
    out3 = jax.block_until_ready(
        linear_regression_forward(x3, weight, bias, min_pallas_elements=0)
    )
    ref3 = x3 @ weight.T + bias
    assert out3.shape == (N3, 1)
    assert jnp.allclose(out3, ref3, atol=1e-6), "mismatch vs reference (ragged N)"

    print("KERNEL_OK")
</pallas_src>

<mosaic_0001>
module attributes {stable_mosaic.version = 11 : i64} {
  func.func @_linreg_kernel(%arg0: i32, %arg1: memref<2xf32, #tpu.memory_space<smem>>, %arg2: memref<16x128xf32, #tpu.memory_space<vmem>>, %arg3: memref<16x128xf32, #tpu.memory_space<vmem>>) attributes {dimension_semantics = [#tpu.dimension_semantics<parallel>], iteration_bounds = array<i64: 2>, scalar_prefetch = 0 : i64, scratch_operands = 0 : i64, tpu.core_type = #tpu.core_type<tc>, window_params = [{transform_indices = @transform_0, window_bounds = array<i64: 2>}, {transform_indices = @transform_1, window_bounds = array<i64: 16, 128>}, {transform_indices = @transform_2, window_bounds = array<i64: 16, 128>}]} {
    %c0 = arith.constant 0 : index
    %0 = memref.load %arg1[%c0] : memref<2xf32, #tpu.memory_space<smem>>
    %c1 = arith.constant 1 : index
    %1 = memref.load %arg1[%c1] : memref<2xf32, #tpu.memory_space<smem>>
    %c0_0 = arith.constant 0 : index
    %c0_1 = arith.constant 0 : index
    %2 = vector.load %arg2[%c0_0, %c0_1] : memref<16x128xf32, #tpu.memory_space<vmem>>, vector<16x128xf32>
    %3 = vector.broadcast %0 : f32 to vector<16x128xf32>
    %4 = arith.mulf %2, %3 : vector<16x128xf32>
    %5 = vector.broadcast %1 : f32 to vector<16x128xf32>
    %6 = arith.addf %4, %5 : vector<16x128xf32>
    %c0_2 = arith.constant 0 : index
    %c0_3 = arith.constant 0 : index
    %7 = vector.load %arg3[%c0_2, %c0_3] : memref<16x128xf32, #tpu.memory_space<vmem>>, vector<16x128xf32>
    tpu.vector_store %arg3[%c0_2, %c0_3], %6 {strides = array<i32>} : memref<16x128xf32, #tpu.memory_space<vmem>>, vector<16x128xf32>,
    return
  }
  func.func @transform_0(%arg0: i32) -> i32 {
    %c0_i32 = arith.constant 0 : i32
    %c0_i32_0 = arith.constant 0 : i32
    return %c0_i32 : i32
  }
  func.func @transform_1(%arg0: i32) -> (i32, i32) {
    %c0_i32 = arith.constant 0 : i32
    %c0_i32_0 = arith.constant 0 : i32
    return %arg0, %c0_i32 : i32, i32
  }
  func.func @transform_2(%arg0: i32) -> (i32, i32) {
    %c0_i32 = arith.constant 0 : i32
    %c0_i32_0 = arith.constant 0 : i32
    return %arg0, %c0_i32 : i32, i32
  }
}

</mosaic_0001>

<bundles_post_ra>
// kernel: tpu_custom_call.1
= control target key start
LH: loop header
LB: loop body
LE: loop exit
PB: predicated region body
PF: predicated region fallthrough
CT: control target
= control target key end

     0   :  { %7 = vsyncpa [#allocation5], 0  ;;  %s694_s0 = inlined_call_operand.hbm [shape: f32[2], index: 0, kind: input, shape index: {}]   ;;  %s695_s1 = inlined_call_operand.hbm [shape: f32[32,128], index: 1, kind: input, shape index: {}]   ;;  %s696_s2 = inlined_call_operand.hbm [shape: f32[32,128], index: 2, kind: output, shape index: {}]  }
   0x1   :  { %8 = vsyncpa [#allocation3], 0 }
   0x2   :  { %10 = vsyncpa [#allocation3 + $0x1], 0 }
   0x3   :  { %11 = vsyncpa [#allocation4], 0 }
   0x4   :  { %13 = vsyncpa [#allocation4 + $0x1], 0  ;;  %s504_s9 = smov 0   ;;  %s506_s10 = smov 0  }
   0x5   :  { %s508_s11 = smov 0   ;;  %s510_s12 = smov 0  }
   0x6 LB: > { %s525_s13 = sadd.s32 4294967295, %s480_s12   ;;  %s287_s14 = sadd.s32 4294967294, %s480_s12   ;;  %s480_s12 = sphi %s510_s12, %s716_s12   ;;  %s476_s11 = sphi %s508_s11, %s715_s11   ;;  %s472_s10 = sphi %s506_s10, %s714_s10   ;;  %s468_s9 = sphi %s504_s9, %s713_s9  }
   0x7   : > { %s529_s15 = sadd.s32 1, %s480_s12   ;;  %s47_s16 = sadd.s32 1, %s476_s11 }
   0x8   : > { %s44_s17 = ssub.s32 %s480_s12, %s529_s15  ;;  %p54_p0 = scmp.ne.s32.totalorder %s476_s11, %s472_s10 }
   0x9   : > { %p45_p1 = scmp.eq.s32.totalorder %s44_s17, 0  ;;  %p55_p2 = scmp.eq.s32.totalorder %s480_s12, 0 }
   0xa   : > { %p60_p3 = scmp.ne.s32.totalorder %s472_s10, %s468_s9  ;;  %p697_p4 = scmp.eq.s32.totalorder %s525_s13, 0 }
   0xb   : > { %s541_s18 = scalar_select %p45_p1, %s476_s11, %s47_s16  }
   0xc   : > { %p543_p5 = por %p55_p2, %p54_p0  ;;  %p549_p6 = por %p697_p4, %p60_p3 }
   0xd   : > { %p84_p7 = scmp.eq.s32.totalorder %s525_s13, 1  ;;  %p90_p8 = scmp.eq.s32.totalorder %s287_s14, 1 }
   0xe   : > { %s701_s20 = scalar_select %p549_p6, 1, 0 }
   0xf   : > { %p288_p9 = scmp.ge.s32.totalorder %s480_s12, 1  ;;  %p97_p10 = scmp.lt.s32.totalorder %s480_s12, 3 }
  0x10   : > { %p556_p11 = por %p84_p7, %p54_p0  ;;  %p560_p12 = por %p90_p8, %p60_p3 }
  0x11   : > { %p564_p13 = pnand %p288_p9, %p97_p10  ;;  %p327_p4 = scmp.lt.s32.totalorder %s480_s12, 2 }
  0x12   : > { %s702_s21 = scalar_select %p556_p11, 1, 0 }
  0x13   : > { %s703_s22 = scalar_select %p560_p12, 1, 0 }
  0x14   : > { %p314_p2 = pneg %p564_p13  ;;  %s119_s24 = sand.u32 1, %s476_s11  }
  0x15   : > { %s304_s25 = sshll.u32 %s480_s12, 8  ;;  %p705_p6 = scmp.eq.s32.totalorder %s525_s13, 0 }
  0x16   : > { %p578_p7 = pnand %p327_p4, %p543_p5  ;;  %s291_s27 = sshll.u32 %s119_s24, 4 }
  0x17   : > { %p315_p0 = pnand %p314_p2, %p705_p6  ;;  %s367_s30 = scalar_lea.hbm %s694_s0, 16 }
  0x18   : > { %p368_p3 = scmp.ne.s32.totalorder %s694_s0, %s367_s30  ;;  %p374_p6 = scmp.lt.u32.totalorder %s367_s30, %s694_s0 }
  0x19   : > { %p369_p8 = pneg %p315_p0 }
  0x1b   : > { %p370_p9 = pnand %p369_p8, %p368_p3 }
  0x1d   : > { %p371_p10 = pneg %p370_p9 }
  0x1f   : > { %p376_p4 = pnand %p374_p6, %p371_p10 }
  0x21   : > { %379 = shalt.err (!%p376_p4)
}
  0x22   : > { %s482_s7 = smov [#allocation2]   ;;  %s597_s19 = scalar_lea.hbm %s695_s1, %s304_s25 }
  0x23   : > { %317 = dma.hbm_to_smem (!%p315_p0), %s694_s0, 16, %s482_s7, [#allocation5]  }
  0x24   : > { %s123_s28 = scalar_lea.vmem [#allocation6], %s291_s27  ;;  %s601_s30 = scalar_lea.sflag [#allocation3], %s119_s24 }
  0x25   : > { %s130_s29 = sshll.u32 %s123_s28, 4  ;;  %s380_s3 = scalar_lea.hbm %s597_s19, 256  ;;  %s599_s29 = int_to_ptr.vmem [resolvable:$true] %s130_s29 }
  0x26   : > { %p381_p5 = scmp.ne.s32.totalorder %s597_s19, %s380_s3  ;;  %p382_p2 = pneg %p578_p7 }
  0x27   : > { %s385_s5 = scalar_lea.hbm %s695_s1, 512  ;;  %p386_p8 = scmp.lt.u32.totalorder %s597_s19, %s695_s1 }
  0x28   : > { %p383_p0 = pnand %p382_p2, %p381_p5  ;;  %p387_p9 = scmp.lt.u32.totalorder %s385_s5, %s380_s3 }
  0x29   : > { %p389_p6 = scmp.lt.u32.totalorder %s380_s3, %s597_s19 }
  0x2a   : > { %p384_p3 = pneg %p383_p0  ;;  %p388_p10 = por %p387_p9, %p386_p8 }
  0x2c   : > { %p390_p4 = por %p389_p6, %p388_p10 }
  0x2e   : > { %p391_p1 = pnand %p390_p4, %p384_p3 }
  0x30   : > { %394 = shalt.err (!%p391_p1)
}
  0x31   : > { %s395_s24 = scalar_lea.vmem %s599_s29, 256  ;;  %s483_s27 = smov [#allocation6]  }
  0x32   : > { %p396_p5 = scmp.ne.s32.totalorder %s599_s29, %s395_s24  ;;  %s400_s8 = sshll.u32 %s483_s27, 4  ;;  %s401_s8 = int_to_ptr.vmem [resolvable:$false] %s400_s8 }
  0x33   : > { %s402_s14 = scalar_lea.vmem %s401_s8, 512  ;;  %p403_p11 = scmp.lt.s32.totalorder %s599_s29, %s401_s8 }
  0x34   : > { %p398_p0 = pnand %p396_p5, %p382_p2  ;;  %p404_p8 = scmp.lt.s32.totalorder %s402_s14, %s395_s24 }
  0x36   : > { %p399_p12 = pneg %p398_p0  ;;  %p405_p9 = por %p404_p8, %p403_p11 }
  0x38   : > { %p406_p10 = pnand %p405_p9, %p399_p12 }
  0x3a   : > { %409 = shalt.err (!%p406_p10)
}
  0x3b   : > { %s484_s16 = smov 128   ;;  %s485_s17 = smov 8  }
  0x3c   : > { %321 = dma.hbm_to_vmem [thread:$0]  (!%p578_p7), %s597_s19, 256, %s599_s29, %s601_s30, %s484_s16, %s484_s16, %s485_s17  }
  0x3d   : > { %142 = sbr.rel (%p564_p13) target bundleno = 103 (0x67), region = 28  ;;  %p707_p1 = scmp.eq.s32.totalorder (!%p564_p13), %s525_s13, 0 }
  0x44   : > { %455 = dma.done.wait (%p707_p1), [#allocation5], 16   ;;  %p708_p2 = pmov %p707_p1 }
  0x45   : > { %s636_s28 = sand.u32 1, %s472_s10   ;;  %p709_p11 = scmp.ne.s32.totalorder %s701_s20, 0 }
  0x46   : > { %457 = vsyncadd (%p708_p2), [#allocation5], 4294967280  ;;  %s296_s3 = sshll.u32 %s636_s28, 4  ;;  %s149_s25 = scalar_lea.sflag [#allocation3], %s636_s28 }
  0x47   : > { %s152_s4 = scalar_lea.vmem [#allocation6], %s296_s3 }
  0x48   : > { %459 = dma.done.wait (%p709_p11), %s149_s25, 256  }
  0x49   : > { %461 = vsyncadd (%p709_p11), %s149_s25, 4294967040 }
  0x4a   : > { %157 = sfence }
  0x4b   : > { %s176_s23 = sld [smem:[#allocation2]]  ;;  %s298_s26 = sld [smem:[#allocation2 + $0x1]]  ;;  %v178_v0 = vld [vmem:[%s152_s4] sm:$0xff]  ;;  %v179_v1 = vld [vmem:[%s152_s4 + $0x8] sm:$0xff] }
  0x4c   : > { %s173_s19 = scalar_lea.vmem [#allocation7], %s296_s3  ;;  %s305_s30 = sshll.u32 %s525_s13, 8 }
  0x4d   : > { %s202_s29 = sshll.u32 %s173_s19, 4  ;;  %s650_s6 = scalar_lea.hbm %s696_s2, %s305_s30  ;;  %s645_s29 = int_to_ptr.vmem [resolvable:$true] %s202_s29 }
  0x4e   : > { %s189_s7 = scalar_lea.sflag [#allocation4], %s636_s28  ;;  %s410_s24 = scalar_lea.vmem %s645_s29, 256 }
  0x4f   : > { %p411_p12 = scmp.ne.s32.totalorder %s645_s29, %s410_s24  ;;  %p710_p13 = scmp.ne.s32.totalorder %s702_s21, 0 }
  0x50   : > { %s486_s13 = smov [#allocation7]  }
  0x51   : > { %v180_v2 = vstv %s176_s23  ;;  %v183_v4 = vstv %s298_s26  ;;  %p412_p7 = pnand %p411_p12, %p710_p13  ;;  %s414_s27 = sshll.u32 %s486_s13, 4  ;;  %s415_s27 = int_to_ptr.vmem [resolvable:$false] %s414_s27 }
  0x52   : > { %v181_v3 = vmul.f32 %v180_v2, %v178_v0  ;;  %v182_v5 = vmul.f32 %v180_v2, %v179_v1  ;;  %s416_s8 = scalar_lea.vmem %s415_s27, 512  ;;  %p417_p6 = scmp.lt.s32.totalorder %s645_s29, %s415_s27 }
  0x53   : > { %p413_p3 = pneg %p412_p7  ;;  %p418_p4 = scmp.lt.s32.totalorder %s416_s8, %s410_s24 }
  0x54   : > { %v184_v6 = vadd.f32 %v183_v4, %v181_v3  ;;  %v185_v7 = vadd.f32 %v183_v4, %v182_v5 }
  0x55   : > { %p419_p5 = por %p418_p4, %p417_p6 }
  0x56   : > { %186 = vst [vmem:[%s173_s19] sm:$0xff] %v184_v6  ;;  %187 = vst [vmem:[%s173_s19 + $0x8] sm:$0xff] %v185_v7 }
  0x57   : > { %p420_p0 = pnand %p419_p5, %p413_p3 }
  0x59   : > { %423 = shalt.err (!%p420_p0)
}
  0x5a   : > { %s424_s14 = scalar_lea.hbm %s650_s6, 256  ;;  %s428_s3 = scalar_lea.hbm %s696_s2, 512 }
  0x5b   : > { %p425_p8 = scmp.ne.s32.totalorder %s650_s6, %s424_s14  ;;  %p429_p1 = scmp.lt.u32.totalorder %s650_s6, %s696_s2 }
  0x5c   : > { %p430_p2 = scmp.lt.u32.totalorder %s428_s3, %s424_s14  ;;  %p432_p12 = scmp.lt.u32.totalorder %s424_s14, %s650_s6 }
  0x5d   : > { %p426_p9 = pnand %p425_p8, %p710_p13 }
  0x5e   : > { %p431_p11 = por %p430_p2, %p429_p1 }
  0x5f   : > { %p427_p10 = pneg %p426_p9 }
  0x60   : > { %p433_p7 = por %p432_p12, %p431_p11 }
  0x62   : > { %p434_p3 = pnand %p433_p7, %p427_p10 }
  0x64   : > { %437 = shalt.err (!%p434_p3)
}
  0x65   : > { %s487_s23 = smov 128   ;;  %s488_s26 = smov 8  }
  0x66   : > { %312 = dma.vmem_to_hbm [thread:$0]  (%p710_p13), %s645_s29, 256, %s650_s6, %s189_s7, %s487_s23, %s487_s23, %s488_s26  }
  0x67 PF: > { %s217_s19 = sand.u32 1, %s468_s9   ;;  %p711_p6 = scmp.ne.s32.totalorder %s703_s22, 0 }
  0x68   : > { %p712_p4 = scmp.ge.s32.totalorder %s480_s12, 2  ;;  %s218_s30 = scalar_lea.sflag [#allocation4], %s217_s19 }
  0x6a   : > { %p323_p5 = pnand %p712_p4, %p711_p6 }
  0x6c   : > { %463 = dma.done.wait (!%p323_p5), %s218_s30, 256  }
  0x6d   : > { %465 = vsyncadd (!%p323_p5), %s218_s30, 4294967040  ;;  %p16_p0 = scmp.ge.s32.totalorder %s529_s15, 4   ;;  %s713_s9 = smov %s472_s10 }
  0x6e   : > { %s714_s10 = smov %s476_s11  ;;  %s715_s11 = smov %s541_s18 }
  0x6f   : > { %s716_s12 = smov %s529_s15  ;;  %18 = sbr.rel (!%p16_p0) target bundleno = 6 (0x6), region = 78 }
  0x76   :  { %223 = vsyncpa [#allocation3], 1 }
  0x77   :  { %225 = vsyncpa [#allocation3 + $0x1], 1 }
  0x78   :  { %226 = vsyncpa [#allocation4], 1 }
  0x79   :  { %228 = vsyncpa [#allocation4 + $0x1], 1 }
  0x7a   :  { %229 = vsyncpa [#allocation5], 1 }
  0x7b   :  { %231 = vsyncpa [#allocation5 + $0x1], 1 }

</bundles_post_ra>
